<compile_context>
chip_gen: v5e
topology: v5e:2x2
jax: 0.10.0
libtpu: 0.0.40
codegen_flags: <defaults>
</compile_context>

<pallas_src>
import functools

import jax
import jax.numpy as jnp
from jax.experimental import pallas as pl
from jax.experimental.pallas import tpu as pltpu


def _round_up(n, m):
    return ((n + m - 1) // m) * m


def mlp_policy_kernel(x_ref, w1_ref, b1_ref, w2_ref, b2_ref, w3_ref, b3_ref,
                      out_ref):
    mxu_dtype = w1_ref.dtype
    # tanh in bf16 when the weights are bf16: the EUP is bf16-native on v6e/v7x
    # (~2x the f32 rate) and the result feeds the next MXU pass with no extra
    # cast.  With f32 weights everything stays f32.
    act_dtype = mxu_dtype if jnp.dtype(mxu_dtype).itemsize < 4 else jnp.float32

    # Cast x to the MXU dtype *after* the VMEM load (cheap VPU work hidden under
    # the MXU/EUP bound) instead of a separate wrapper-side XLA pass over HBM.
    x = x_ref[...].astype(mxu_dtype)

    # Hidden layer 1: MXU matmul, f32 accumulation, f32 bias, tanh.
    a = jnp.dot(x, w1_ref[...], preferred_element_type=jnp.float32)
    a = a + b1_ref[...].astype(jnp.float32)
    h = jnp.tanh(a.astype(act_dtype)).astype(mxu_dtype)

    # Hidden layer 2.
    a = jnp.dot(h, w2_ref[...], preferred_element_type=jnp.float32)
    a = a + b2_ref[...].astype(jnp.float32)
    h = jnp.tanh(a.astype(act_dtype)).astype(mxu_dtype)

    # Output head: (tb, 2*action_dim) = mean || log_std, accumulated in f32.
    out = jnp.dot(h, w3_ref[...], preferred_element_type=jnp.float32)
    out = out + b3_ref[...].astype(jnp.float32)

    # Apply exp on the log_std half via a (1, out_dim) lane mask + broadcast
    # select -> one contiguous, lane-dense store (no unaligned out[:, a:] slice).
    out_dim = out_ref.shape[-1]
    a_dim = out_dim // 2
    col = jax.lax.broadcasted_iota(jnp.int32, (1, out_dim), 1)
    out = jnp.where(col >= a_dim, jnp.exp(out), out)
    out_ref[...] = out.astype(out_ref.dtype)


def mlp_policy_forward(x, params, action_dim, *, tile_b=4096):
    """Run the MLPPolicy forward pass. Returns (action_mean, action_std), f32.

    x stays in its stored dtype (typically f32); to use the bf16 MXU path,
    pre-cast the weights once with cast_weights_for_mxu() — biases stay f32.
    """
    w1, b1, w2, b2, w3, b3 = params
    batch, input_dim = x.shape
    h1 = w1.shape[1]
    h2 = w2.shape[1]
    out_dim = w3.shape[1]  # 2 * action_dim

    # Sublane granularity for the batch tile: 16 when the MXU dtype is 16-bit
    # (packed sublanes), 8 otherwise.
    sub = 16 if jnp.dtype(w1.dtype).itemsize < 4 else 8

    # Choose the batch tile:
    #   * as large as tile_b (amortize per-grid-step overhead),
    #   * but split into >=2 steps when possible so v7x's 2nd TensorCore works,
    #   * tb is a multiple of `sub`, or equals the full batch (single block),
    #   * no jnp.pad of x: a non-divisible last block is handled by Pallas
    #     (masked writes for the out-of-bounds tail rows).
    n_tiles = pl.cdiv(batch, tile_b)
    if n_tiles == 1 and batch > sub:
        n_tiles = 2
    tb = _round_up(pl.cdiv(batch, n_tiles), sub)
    if tb >= batch:
        tb = batch
    grid = (pl.cdiv(batch, tb),)

    x_spec = pl.BlockSpec((tb, input_dim), lambda i: (i, 0))
    out_spec = pl.BlockSpec((tb, out_dim), lambda i: (i, 0))

    def resident(p):  # weights/biases: same block every grid step -> stay in VMEM
        return pl.BlockSpec(p.shape, lambda i: (0, 0))

    bytes_accessed = int(
        batch * input_dim * x.dtype.itemsize                        # x stream
        + sum(int(p.size) * p.dtype.itemsize
              for p in (w1, b1, w2, b2, w3, b3))                    # weights once
        + batch * out_dim * 4                                       # f32 output
    )
    flops = int(2 * batch * (input_dim * h1 + h1 * h2 + h2 * out_dim))
    transcendentals = int(batch * (h1 + h2 + out_dim))              # tanh + exp

    out = pl.pallas_call(
        mlp_policy_kernel,
        out_shape=jax.ShapeDtypeStruct((batch, out_dim), jnp.float32),
        grid=grid,
        in_specs=[
            x_spec,
            resident(w1), resident(b1),
            resident(w2), resident(b2),
            resident(w3), resident(b3),
        ],
        out_specs=out_spec,
        compiler_params=pltpu.CompilerParams(
            dimension_semantics=("parallel",),      # megacore / v7x 2-TC sharding
            vmem_limit_bytes=32 * 1024 * 1024,      # tb<=4096 fits; safe on v7x 64 MiB
        ),
        cost_estimate=pl.CostEstimate(
            flops=flops,
            transcendentals=transcendentals,
            bytes_accessed=bytes_accessed,
        ),
    )(x, w1, b1, w2, b2, w3, b3)

    action_mean = out[:, :action_dim]
    action_std = out[:, action_dim:]
    return action_mean, action_std


def cast_weights_for_mxu(params, dtype=jnp.bfloat16):
    """Cast ONLY the matmul weights to a low-precision MXU dtype, once at init.
    Biases stay f32 (they are added to the f32 accumulator)."""
    w1, b1, w2, b2, w3, b3 = params
    return (w1.astype(dtype), b1, w2.astype(dtype), b2, w3.astype(dtype), b3)


def init_linear(key, in_dim, out_dim):
    """Deterministic init mimicking torch.nn.Linear defaults:
    U(-1/sqrt(fan_in), 1/sqrt(fan_in)) for weight and bias.
    Weight stored as (in_dim, out_dim)."""
    kw, kb = jax.random.split(key)
    bound = 1.0 / jnp.sqrt(jnp.float32(in_dim))
    w = jax.random.uniform(kw, (in_dim, out_dim), jnp.float32, -bound, bound)
    b = jax.random.uniform(kb, (1, out_dim), jnp.float32, -bound, bound)
    return w, b


def init_mlp_policy_params(key, input_dim, action_dim, hidden_sizes=(128, 128)):
    keys = jax.random.split(key, len(hidden_sizes) + 1)
    params = []
    last_dim = input_dim
    for i, h in enumerate(hidden_sizes):
        w, b = init_linear(keys[i], last_dim, h)
        params.extend([w, b])
        last_dim = h
    # state_dependent_var=True head: Linear(last_dim, 2*action_dim),
    # weight *= 0.1, bias *= 0.0
    w3, b3 = init_linear(keys[-1], last_dim, 2 * action_dim)
    params.extend([w3 * 0.1, b3 * 0.0])
    return tuple(params)


def reference_forward(x, params, action_dim):
    """Pure-JAX reference for correctness check."""
    w1, b1, w2, b2, w3, b3 = params
    h = jnp.tanh(x @ w1 + b1)
    h = jnp.tanh(h @ w2 + b2)
    out = h @ w3 + b3
    return out[:, :action_dim], jnp.exp(out[:, action_dim:])


if __name__ == "__main__":
    batch = 2
    input_dim = 16
    action_dim = 4
    hidden_sizes = (128, 128)

    key = jax.random.PRNGKey(0)
    k_params, k_x, k_x2 = jax.random.split(key, 3)

    params = init_mlp_policy_params(k_params, input_dim, action_dim, hidden_sizes)
    x = jax.random.normal(k_x, (batch, input_dim), jnp.float32)

    # Small-batch f32 path (single full-dim block, tight tolerance vs. reference).
    fwd = jax.jit(functools.partial(mlp_policy_forward, action_dim=action_dim))
    mean, std = fwd(x, params)
    jax.block_until_ready((mean, std))
    ref_mean, ref_std = reference_forward(x, params, action_dim)
    assert mean.shape == (batch, action_dim)
    assert std.shape == (batch, action_dim)
    assert jnp.allclose(mean, ref_mean, atol=1e-5, rtol=1e-5)
    assert jnp.allclose(std, ref_std, atol=1e-5, rtol=1e-5)

    # Multi-tile grid with a ragged (non-divisible) last block — no jnp.pad copy.
    batch2 = 300
    x2 = jax.random.normal(k_x2, (batch2, input_dim), jnp.float32)
    mean2, std2 = mlp_policy_forward(x2, params, action_dim, tile_b=128)
    jax.block_until_ready((mean2, std2))
    ref_mean2, ref_std2 = reference_forward(x2, params, action_dim)
    assert mean2.shape == (batch2, action_dim)
    assert jnp.allclose(mean2, ref_mean2, atol=1e-5, rtol=1e-5)
    assert jnp.allclose(std2, ref_std2, atol=1e-5, rtol=1e-5)

    # Default tile_b (splits into 2 tiles so both v7x TensorCores are busy).
    mean2b, std2b = mlp_policy_forward(x2, params, action_dim)
    jax.block_until_ready((mean2b, std2b))
    assert jnp.allclose(mean2b, ref_mean2, atol=1e-5, rtol=1e-5)
    assert jnp.allclose(std2b, ref_std2, atol=1e-5, rtol=1e-5)

    # bf16 MXU path: weights pre-cast ONCE (biases stay f32); x stays f32 in HBM
    # and is cast in-VMEM; tanh runs in bf16 (native EUP rate on v6e/v7x).
    params_bf16 = cast_weights_for_mxu(params, jnp.bfloat16)
    mean3, std3 = mlp_policy_forward(x2, params_bf16, action_dim, tile_b=128)
    jax.block_until_ready((mean3, std3))
    assert jnp.allclose(mean3, ref_mean2, atol=5e-2, rtol=5e-2)
    assert jnp.allclose(std3, ref_std2, atol=5e-2, rtol=5e-2)

    print("KERNEL_OK")
</pallas_src>

<mosaic_0001>
module attributes {stable_mosaic.version = 11 : i64} {
  func.func @mlp_policy_kernel(%arg0: i32, %arg1: memref<2x16xf32, #tpu.memory_space<vmem>>, %arg2: memref<16x128xf32, #tpu.memory_space<vmem>>, %arg3: memref<1x128xf32, #tpu.memory_space<vmem>>, %arg4: memref<128x128xf32, #tpu.memory_space<vmem>>, %arg5: memref<1x128xf32, #tpu.memory_space<vmem>>, %arg6: memref<128x8xf32, #tpu.memory_space<vmem>>, %arg7: memref<1x8xf32, #tpu.memory_space<vmem>>, %arg8: memref<2x8xf32, #tpu.memory_space<vmem>>) attributes {dimension_semantics = [#tpu.dimension_semantics<parallel>], iteration_bounds = array<i64: 1>, scalar_prefetch = 0 : i64, scratch_operands = 0 : i64, tpu.core_type = #tpu.core_type<tc>, window_params = [{transform_indices = @transform_0, window_bounds = array<i64: 2, 16>}, {pipeline_mode = #tpu.pipeline_mode<synchronous>, transform_indices = @transform_1, window_bounds = array<i64: 16, 128>}, {pipeline_mode = #tpu.pipeline_mode<synchronous>, transform_indices = @transform_2, window_bounds = array<i64: 1, 128>}, {pipeline_mode = #tpu.pipeline_mode<synchronous>, transform_indices = @transform_3, window_bounds = array<i64: 128, 128>}, {pipeline_mode = #tpu.pipeline_mode<synchronous>, transform_indices = @transform_4, window_bounds = array<i64: 1, 128>}, {pipeline_mode = #tpu.pipeline_mode<synchronous>, transform_indices = @transform_5, window_bounds = array<i64: 128, 8>}, {pipeline_mode = #tpu.pipeline_mode<synchronous>, transform_indices = @transform_6, window_bounds = array<i64: 1, 8>}, {transform_indices = @transform_7, window_bounds = array<i64: 2, 8>}]} {
    %c0 = arith.constant 0 : index
    %c0_0 = arith.constant 0 : index
    %0 = vector.load %arg1[%c0, %c0_0] : memref<2x16xf32, #tpu.memory_space<vmem>>, vector<2x16xf32>
    %c0_1 = arith.constant 0 : index
    %c0_2 = arith.constant 0 : index
    %1 = vector.load %arg2[%c0_1, %c0_2] : memref<16x128xf32, #tpu.memory_space<vmem>>, vector<16x128xf32>
    %cst = arith.constant dense<0.000000e+00> : vector<2x128xf32>
    %2 = tpu.matmul %0, %1, %cst {dimension_numbers = #tpu.dot_dimension_numbers<[1], [0], [0], [1], [0, 0, 1, 1], [], []>} : vector<2x16xf32>, vector<16x128xf32>, vector<2x128xf32> -> vector<2x128xf32>
    %c0_3 = arith.constant 0 : index
    %c0_4 = arith.constant 0 : index
    %3 = vector.load %arg3[%c0_3, %c0_4] : memref<1x128xf32, #tpu.memory_space<vmem>>, vector<1x128xf32>
    %4 = vector.broadcast %3 : vector<1x128xf32> to vector<2x128xf32>
    %5 = arith.addf %2, %4 : vector<2x128xf32>
    %6 = math.tanh %5 : vector<2x128xf32>
    %c0_5 = arith.constant 0 : index
    %c0_6 = arith.constant 0 : index
    %7 = vector.load %arg4[%c0_5, %c0_6] : memref<128x128xf32, #tpu.memory_space<vmem>>, vector<128x128xf32>
    %cst_7 = arith.constant dense<0.000000e+00> : vector<2x128xf32>
    %8 = tpu.matmul %6, %7, %cst_7 {dimension_numbers = #tpu.dot_dimension_numbers<[1], [0], [0], [1], [0, 0, 1, 1], [], []>} : vector<2x128xf32>, vector<128x128xf32>, vector<2x128xf32> -> vector<2x128xf32>
    %c0_8 = arith.constant 0 : index
    %c0_9 = arith.constant 0 : index
    %9 = vector.load %arg5[%c0_8, %c0_9] : memref<1x128xf32, #tpu.memory_space<vmem>>, vector<1x128xf32>
    %10 = vector.broadcast %9 : vector<1x128xf32> to vector<2x128xf32>
    %11 = arith.addf %8, %10 : vector<2x128xf32>
    %12 = math.tanh %11 : vector<2x128xf32>
    %c0_10 = arith.constant 0 : index
    %c0_11 = arith.constant 0 : index
    %13 = vector.load %arg6[%c0_10, %c0_11] : memref<128x8xf32, #tpu.memory_space<vmem>>, vector<128x8xf32>
    %cst_12 = arith.constant dense<0.000000e+00> : vector<2x8xf32>
    %14 = tpu.matmul %12, %13, %cst_12 {dimension_numbers = #tpu.dot_dimension_numbers<[1], [0], [0], [1], [0, 0, 1, 1], [], []>} : vector<2x128xf32>, vector<128x8xf32>, vector<2x8xf32> -> vector<2x8xf32>
    %c0_13 = arith.constant 0 : index
    %c0_14 = arith.constant 0 : index
    %15 = vector.load %arg7[%c0_13, %c0_14] : memref<1x8xf32, #tpu.memory_space<vmem>>, vector<1x8xf32>
    %16 = vector.broadcast %15 : vector<1x8xf32> to vector<2x8xf32>
    %17 = arith.addf %14, %16 : vector<2x8xf32>
    %18 = tpu.iota {dimensions = array<i32: 1>} : vector<1x8xi32>
    %c4_i32 = arith.constant 4 : i32
    %19 = vector.broadcast %c4_i32 : i32 to vector<1x8xi32>
    %20 = arith.cmpi sge, %18, %19 : vector<1x8xi32>
    %21 = math.exp %17 : vector<2x8xf32>
    %22 = vector.shape_cast %20 : vector<1x8xi1> to vector<1x8xi1>
    %23 = vector.broadcast %22 : vector<1x8xi1> to vector<2x8xi1>
    %24 = arith.select %23, %21, %17 : vector<2x8xi1>, vector<2x8xf32>
    %c0_15 = arith.constant 0 : index
    %c0_16 = arith.constant 0 : index
    %25 = vector.load %arg8[%c0_15, %c0_16] : memref<2x8xf32, #tpu.memory_space<vmem>>, vector<2x8xf32>
    tpu.vector_store %arg8[%c0_15, %c0_16], %24 {strides = array<i32>} : memref<2x8xf32, #tpu.memory_space<vmem>>, vector<2x8xf32>,
    return
  }
  func.func @transform_0(%arg0: i32) -> (i32, i32) {
    %c0_i32 = arith.constant 0 : i32
    %c0_i32_0 = arith.constant 0 : i32
    return %arg0, %c0_i32 : i32, i32
  }
  func.func @transform_1(%arg0: i32) -> (i32, i32) {
    %c0_i32 = arith.constant 0 : i32
    %c0_i32_0 = arith.constant 0 : i32
    %c0_i32_1 = arith.constant 0 : i32
    return %c0_i32, %c0_i32_0 : i32, i32
  }
  func.func @transform_2(%arg0: i32) -> (i32, i32) {
    %c0_i32 = arith.constant 0 : i32
    %c0_i32_0 = arith.constant 0 : i32
    %c0_i32_1 = arith.constant 0 : i32
    return %c0_i32, %c0_i32_0 : i32, i32
  }
  func.func @transform_3(%arg0: i32) -> (i32, i32) {
    %c0_i32 = arith.constant 0 : i32
    %c0_i32_0 = arith.constant 0 : i32
    %c0_i32_1 = arith.constant 0 : i32
    return %c0_i32, %c0_i32_0 : i32, i32
  }
  func.func @transform_4(%arg0: i32) -> (i32, i32) {
    %c0_i32 = arith.constant 0 : i32
    %c0_i32_0 = arith.constant 0 : i32
    %c0_i32_1 = arith.constant 0 : i32
    return %c0_i32, %c0_i32_0 : i32, i32
  }
  func.func @transform_5(%arg0: i32) -> (i32, i32) {
    %c0_i32 = arith.constant 0 : i32
    %c0_i32_0 = arith.constant 0 : i32
    %c0_i32_1 = arith.constant 0 : i32
    return %c0_i32, %c0_i32_0 : i32, i32
  }
  func.func @transform_6(%arg0: i32) -> (i32, i32) {
    %c0_i32 = arith.constant 0 : i32
    %c0_i32_0 = arith.constant 0 : i32
    %c0_i32_1 = arith.constant 0 : i32
    return %c0_i32, %c0_i32_0 : i32, i32
  }
  func.func @transform_7(%arg0: i32) -> (i32, i32) {
    %c0_i32 = arith.constant 0 : i32
    %c0_i32_0 = arith.constant 0 : i32
    return %arg0, %c0_i32 : i32, i32
  }
}

</mosaic_0001>

<bundles_post_ra>
// kernel: mlp_policy_forward.1
= control target key start
LH: loop header
LB: loop body
LE: loop exit
PB: predicated region body
PF: predicated region fallthrough
CT: control target
= control target key end

     0   :  { %12 = vsyncpa [#allocation3], 0  ;;  %s209_s27 = smov [#allocation2]   ;;  %s210_s29 = smov 128   ;;  %s366_s0 = inlined_call_operand.vmem [shape: f32[2,16], index: 0, kind: input, shape index: {}]   ;;  %s367_s1 = inlined_call_operand.hbm [shape: f32[16,128], index: 1, kind: input, shape index: {}]   ;;  %s368_s2 = inlined_call_operand.vmem [shape: f32[1,128], index: 2, kind: input, shape index: {}]   ;;  %s369_s3 = inlined_call_operand.vmem [shape: f32[128,128], index: 3, kind: input, shape index: {}]   ;;  %s370_s4 = inlined_call_operand.vmem [shape: f32[1,128], index: 4, kind: input, shape index: {}]   ;;  %s371_s5 = inlined_call_operand.vmem [shape: f32[128,8], index: 5, kind: input, shape index: {}]   ;;  %s372_s6 = inlined_call_operand.vmem [shape: f32[1,8], index: 6, kind: input, shape index: {}]   ;;  %s373_s7 = inlined_call_operand.vmem [shape: f32[2,8], index: 7, kind: output, shape index: {}]  }
   0x1   :  { %s19_s26 = sshll.u32 %s367_s1, 4  ;;  %s21_s28 = sshll.u32 %s209_s27, 4  ;;  %s20_s26 = int_to_ptr.hbm [resolvable:$true] %s19_s26  ;;  %s22_s28 = int_to_ptr.vmem [resolvable:$true] %s21_s28 }
   0x2   :  { %s211_s30 = smov 8  }
   0x3   :  { %27 = dma.hbm_to_vmem [thread:$0]  %s20_s26, 256, %s22_s28, [#allocation3], %s210_s29, %s210_s29, %s211_s30  }
   0x4   :  { %207 = dma.done.wait [#allocation3], 256  }
   0x5   :  { %208 = vsyncadd [#allocation3], 4294967040  ;;  %v44_v0 = vld [vmem:[#allocation2 + $0x8] sm:$0xff]  ;;  %v43_v1 = vld [vmem:[#allocation2] sm:$0xff]  ;;  %vm49_vm0 = vcmask 130048   ;;  %v155_v46 = vlaneseq  ;;  %vm163_vm2 = vcmask 58368  }
   0x6   :  { %67 = vmatpush.msra.mxu0 %v44_v0  ;;  %v42_v2 = vld [vmem:[%s366_s0] sm:$0x3]  ;;  %v89_v3 = vld [vmem:[%s369_s3 + $0x78] sm:$0xff]  ;;  %v88_v4 = vld [vmem:[%s369_s3 + $0x70] sm:$0xff] }
   0x7   :  { %94 = vmatpush.msra.mxu1 %v89_v3  ;;  %v87_v5 = vld [vmem:[%s369_s3 + $0x68] sm:$0xff]  ;;  %v86_v6 = vld [vmem:[%s369_s3 + $0x60] sm:$0xff]  ;;  %v85_v7 = vld [vmem:[%s369_s3 + $0x58] sm:$0xff]  ;;  %v156_v48 = vand.u32 127, %v155_v46 }
   0x8   :  { %68 = vmatpush.msra.mxu0 %v43_v1  ;;  %v84_v8 = vld [vmem:[%s369_s3 + $0x50] sm:$0xff]  ;;  %v83_v9 = vld [vmem:[%s369_s3 + $0x48] sm:$0xff]  ;;  %v82_v10 = vld [vmem:[%s369_s3 + $0x40] sm:$0xff] }
   0x9   :  { %170 = vmatmul.msk.f32.vlgmr.msra.gmra.mxu0 %vm49_vm0, %v42_v2  ;;  %95 = vmatpush.msra.mxu1 %v88_v4  ;;  %v81_v11 = vld [vmem:[%s369_s3 + $0x38] sm:$0xff]  ;;  %v80_v12 = vld [vmem:[%s369_s3 + $0x30] sm:$0xff]  ;;  %v79_v13 = vld [vmem:[%s369_s3 + $0x28] sm:$0xff]  ;;  %vm157_vm1 = vcmp.ge.s32.totalorder %v156_v48, 4 }
   0xa   :  { %v78_v14 = vld [vmem:[%s369_s3 + $0x20] sm:$0xff]  ;;  %v77_v15 = vld [vmem:[%s369_s3 + $0x18] sm:$0xff]  ;;  %v76_v16 = vld [vmem:[%s369_s3 + $0x10] sm:$0xff] }
   0xb   :  { %96 = vmatpush.msra.mxu1 %v87_v5  ;;  %v75_v17 = vld [vmem:[%s369_s3 + $0x8] sm:$0xff]  ;;  %v74_v18 = vld [vmem:[%s369_s3] sm:$0xff]  ;;  %v130_v19 = vld [vmem:[%s371_s5 + $0x78] sm:$0xff] }
   0xc   :  { %v129_v20 = vld [vmem:[%s371_s5 + $0x70] sm:$0xff]  ;;  %135 = vmatpush.msra.mxu2 %v130_v19  ;;  %v128_v21 = vld [vmem:[%s371_s5 + $0x68] sm:$0xff]  ;;  %v127_v22 = vld [vmem:[%s371_s5 + $0x60] sm:$0xff] }
   0xd   :  { %97 = vmatpush.msra.mxu1 %v86_v6  ;;  %v126_v23 = vld [vmem:[%s371_s5 + $0x58] sm:$0xff]  ;;  %v125_v24 = vld [vmem:[%s371_s5 + $0x50] sm:$0xff]  ;;  %v124_v25 = vld [vmem:[%s371_s5 + $0x48] sm:$0xff] }
   0xe   :  { %136 = vmatpush.msra.mxu2 %v129_v20  ;;  %v123_v26 = vld [vmem:[%s371_s5 + $0x40] sm:$0xff]  ;;  %v122_v27 = vld [vmem:[%s371_s5 + $0x38] sm:$0xff]  ;;  %v121_v28 = vld [vmem:[%s371_s5 + $0x30] sm:$0xff] }
   0xf   :  { %98 = vmatpush.msra.mxu1 %v85_v7  ;;  %v120_v29 = vld [vmem:[%s371_s5 + $0x28] sm:$0xff]  ;;  %v174_v30 = vld [vmem:[%s368_s2] ss:$0 sm:$0xff]  ;;  %v118_v35 = vld [vmem:[%s371_s5 + $0x18] sm:$0xff] }
  0x10   :  { %137 = vmatpush.msra.mxu2 %v128_v21  ;;  %v119_v34 = vld [vmem:[%s371_s5 + $0x20] sm:$0xff]  ;;  %v117_v36 = vld [vmem:[%s371_s5 + $0x10] sm:$0xff]  ;;  %v116_v37 = vld [vmem:[%s371_s5 + $0x8] sm:$0xff] }
  0x11   :  { %99 = vmatpush.msra.mxu1 %v84_v8  ;;  %v115_v38 = vld [vmem:[%s371_s5] sm:$0xff] }
  0x12   :  { %138 = vmatpush.msra.mxu2 %v127_v22  ;;  %v175_v39 = vld [vmem:[%s370_s4] ss:$0 sm:$0xff] }
  0x13   :  { %100 = vmatpush.msra.mxu1 %v83_v9  ;;  %v176_v43 = vld [vmem:[%s372_s6] ss:$0 sm:$0xff] }
  0x14   :  { %139 = vmatpush.msra.mxu2 %v126_v23 }
  0x15   :  { %101 = vmatpush.msra.mxu1 %v82_v10 }
  0x16   :  { %140 = vmatpush.msra.mxu2 %v125_v24 }
  0x17   :  { %102 = vmatpush.msra.mxu1 %v81_v11 }
  0x18   :  { %141 = vmatpush.msra.mxu2 %v124_v25 }
  0x19   :  { %103 = vmatpush.msra.mxu1 %v80_v12 }
  0x1a   :  { %142 = vmatpush.msra.mxu2 %v123_v26 }
  0x1b   :  { %104 = vmatpush.msra.mxu1 %v79_v13 }
  0x1c   :  { %143 = vmatpush.msra.mxu2 %v122_v27 }
  0x1d   :  { %105 = vmatpush.msra.mxu1 %v78_v14 }
  0x1e   :  { %144 = vmatpush.msra.mxu2 %v121_v28 }
  0x1f   :  { %106 = vmatpush.msra.mxu1 %v77_v15 }
  0x20   :  { %145 = vmatpush.msra.mxu2 %v120_v29 }
  0x21   :  { %107 = vmatpush.msra.mxu1 %v76_v16 }
  0x22   :  { %146 = vmatpush.msra.mxu2 %v119_v34 }
  0x23   :  { %108 = vmatpush.msra.mxu1 %v75_v17 }
  0x24   :  { %147 = vmatpush.msra.mxu2 %v118_v35 }
  0x25   :  { %109 = vmatpush.msra.mxu1 %v74_v18 }
  0x26   :  { %148 = vmatpush.msra.mxu2 %v117_v36 }
  0x28   :  { %149 = vmatpush.msra.mxu2 %v116_v37 }
  0x2a   :  { %150 = vmatpush.msra.mxu2 %v115_v38 }
  0x86   :  { %v70_v31 = vpop.f32.mrf.mxu0 }
  0x87   :  { %v71_v32 = vadd.f32 %v174_v30, %v70_v31 }
  0x89   :  { %177 = vtanh.f32 %v71_v32 }
  0x8f   :  { %v178_v33 = vpop.eup %177 }
  0x90   :  { %110 = vmatmul.f32.vlgmr.msra.gmra.mxu1 %v178_v33 }
 0x10d   :  { %v111_v40 = vpop.f32.mrf.mxu1 }
 0x10e   :  { %v112_v41 = vadd.f32 %v175_v39, %v111_v40 }
 0x110   :  { %179 = vtanh.f32 %v112_v41 }
 0x116   :  { %v180_v42 = vpop.eup %179 }
 0x117   :  { %151 = vmatmul.f32.vlgmr.msra.gmra.mxu2 %v180_v42 }
 0x19a   :  { %v152_v44 = vpop.f32.mrf.mxu2 }
 0x19b   :  { %v153_v45 = vadd.f32 %v176_v43, %v152_v44 }
 0x19d   :  { %v158_v47 = vmul.f32 1.442695, %v153_v45 }
 0x19f   :  { %181 = vpow2.f32 %v158_v47 }
 0x1a5   :  { %v182_v49 = vpop.eup %181 }
 0x1a6   :  { %v162_v50 = vsel %vm157_vm1, %v182_v49, %v153_v45 }
 0x1a7   :  { %164 = vst.msk [vmem:[%s373_s7] sm:$0x3] %vm163_vm2, %v162_v50 }
 0x1a8   :  { %169 = vsyncpa [#allocation3], 1 }

</bundles_post_ra>
